<compile_context>
chip_gen: v7x
topology: tpu7x:2x2x1
jax: 0.10.0
libtpu: 0.0.40
codegen_flags: <defaults>
</compile_context>

<pallas_src>
import functools

import jax
import jax.numpy as jnp
from jax import lax
from jax.experimental import pallas as pl
from jax.experimental.pallas import tpu as pltpu


_EPS = 1e-30  # guards rsqrt for all-zero (padded) rows only


def _cos_sse_kernel(weighted, x_ref, y_ref, tgt_ref, *rest):
    """One (i, j) tile of sum_w((cos_sim(x_i, y_j) - tgt_ij)^2).

    Outputs are per-row-of-x partial sums, accumulated over the j grid axis
    (output block index depends only on i, so it stays resident over j).
    """
    if weighted:
        cof_ref, sse_ref, wsum_ref = rest
    else:
        cof_ref, wsum_ref = None, None
        (sse_ref,) = rest

    j = pl.program_id(1)

    @pl.when(j == 0)
    def _init():
        sse_ref[...] = jnp.zeros_like(sse_ref)
        if weighted:
            wsum_ref[...] = jnp.zeros_like(wsum_ref)

    # Row-normalize both operands: rsqrt goes to the EUP, scaling is O(rows*D).
    x32 = x_ref[...].astype(jnp.float32)
    y32 = y_ref[...].astype(jnp.float32)
    x_inv = lax.rsqrt(jnp.maximum(jnp.sum(x32 * x32, axis=1, keepdims=True), _EPS))
    y_inv = lax.rsqrt(jnp.maximum(jnp.sum(y32 * y32, axis=1, keepdims=True), _EPS))
    # Keep MXU operands in the native input dtype (bf16 stays bf16);
    # accumulation is f32 via preferred_element_type.
    x_hat = (x32 * x_inv).astype(x_ref.dtype)
    y_hat = (y32 * y_inv).astype(y_ref.dtype)

    # (tm, tn) cosine-similarity tile; contract the feature axis of both
    # operands directly (no explicit transpose).
    sn = lax.dot_general(x_hat, y_hat, (((1,), (1,)), ((), ())),
                         preferred_element_type=jnp.float32)

    d = sn - tgt_ref[...].astype(jnp.float32)
    sq = d * d
    if weighted:
        cof = cof_ref[...].astype(jnp.float32)
        sse_ref[...] += jnp.sum(sq * cof, axis=1, keepdims=True)
        wsum_ref[...] += jnp.sum(cof, axis=1, keepdims=True)
    else:
        sse_ref[...] += jnp.sum(sq, axis=1, keepdims=True)


def _round_up(n, m):
    return ((n + m - 1) // m) * m


def _sublane_multiple(*arrays):
    itemsize = min(jnp.dtype(a.dtype).itemsize for a in arrays)
    return max(8, 32 // itemsize)  # f32 -> 8, bf16 -> 16, int8/fp8 -> 32


def _pad2d(x, rows, cols):
    pr, pc = rows - x.shape[0], cols - x.shape[1]
    if pr or pc:
        x = jnp.pad(x, ((0, pr), (0, pc)))
    return x


def _cos_sim_sse(x, y, tgt, cof=None, *, tile_m=256, tile_n=256):
    """Tiled (weighted) SSE between cos-sim(rows of x, rows of y) and tgt.

    Returns sum((cos - tgt)^2)                 if cof is None,
    or     (sum((cos - tgt)^2 * cof), sum(cof)) otherwise.
    """
    m, d = x.shape
    n, d2 = y.shape
    assert d == d2 and tgt.shape == (m, n)
    weighted = cof is not None

    arrays = (x, y, tgt) + ((cof,) if weighted else ())
    rm = _sublane_multiple(*arrays)

    # Lane-pad the feature axis; zero columns change neither dots nor norms.
    dp = _round_up(d, 128)
    # Row tiles must be multiples of the sublane packing; sub-tiles along the
    # lane axis of the target must be multiples of 128 (or the full dim).
    tile_m = _round_up(tile_m, rm)
    tile_n = max(128, _round_up(tile_n, 128))
    m_pad8 = _round_up(m, rm)
    n_pad8 = _round_up(n, rm)
    tm = m_pad8 if m_pad8 <= tile_m else tile_m
    tn = n_pad8 if n_pad8 <= tile_n else tile_n
    mp = _round_up(m, tm)
    np_ = _round_up(n, tn)

    args = [_pad2d(x, mp, dp), _pad2d(y, np_, dp), _pad2d(tgt, mp, np_)]

    x_spec = pl.BlockSpec((tm, dp), lambda i, j: (i, 0))
    y_spec = pl.BlockSpec((tn, dp), lambda i, j: (j, 0))
    t_spec = pl.BlockSpec((tm, tn), lambda i, j: (i, j))
    o_spec = pl.BlockSpec((tm, 1), lambda i, j: (i, 0))

    in_specs = [x_spec, y_spec, t_spec]
    out_shape = [jax.ShapeDtypeStruct((mp, 1), jnp.float32)]
    out_specs = [o_spec]
    if weighted:
        args.append(_pad2d(cof, mp, np_))
        in_specs.append(t_spec)
        out_shape.append(jax.ShapeDtypeStruct((mp, 1), jnp.float32))
        out_specs.append(o_spec)

    outs = pl.pallas_call(
        functools.partial(_cos_sse_kernel, weighted),
        grid=(mp // tm, np_ // tn),
        in_specs=in_specs,
        out_shape=out_shape,
        out_specs=out_specs,
        compiler_params=pltpu.CompilerParams(
            dimension_semantics=("parallel", "arbitrary"),
            vmem_limit_bytes=32 * 1024 * 1024,
        ),
    )(*args)

    if weighted:
        sse, wsum = outs
        return jnp.sum(sse), jnp.sum(wsum)
    return jnp.sum(outs[0])


def gba_loss(e, sr, f, sp, dti, cof, *, tile_m=256, tile_n=256):
    """Pallas implementation of GBALoss.forward. Returns a scalar f32."""
    ne, nf = e.shape[0], f.shape[0]
    sse1 = _cos_sim_sse(e, e, sr, tile_m=tile_m, tile_n=tile_n)
    sse2 = _cos_sim_sse(f, f, sp, tile_m=tile_m, tile_n=tile_n)
    sse3, cof_sum = _cos_sim_sse(e, f, dti, cof=cof, tile_m=tile_m, tile_n=tile_n)
    los1 = sse1 / float(ne * ne)
    los2 = sse2 / float(nf * nf)
    # TODO(synk): like the PyTorch reference, an all-zero `cof` yields inf/nan.
    los3 = sse3 / cof_sum
    return (los1 + los2 + 0.33 * los3).astype(jnp.float32)


def _gba_loss_ref(e, sr, f, sp, dti, cof):
    """Pure-JAX reference for validation."""
    e = e.astype(jnp.float32)
    f = f.astype(jnp.float32)
    en = jnp.sqrt(jnp.sum(e * e, axis=1, keepdims=True))
    fn = jnp.sqrt(jnp.sum(f * f, axis=1, keepdims=True))
    SN = (e @ e.T) / (en @ en.T)
    los1 = jnp.sum((SN - sr) ** 2) / (e.shape[0] ** 2)
    SNp = (f @ f.T) / (fn @ fn.T)
    los2 = jnp.sum((SNp - sp) ** 2) / (f.shape[0] ** 2)
    SN3 = (e @ f.T) / (en @ fn.T)
    los3 = jnp.sum((SN3 - dti) ** 2 * cof) / jnp.sum(cof)
    return los1 + los2 + 0.33 * los3


if __name__ == "__main__":
    key = jax.random.PRNGKey(0)
    k1, k2, k3, k4, k5, k6 = jax.random.split(key, 6)

    ne, nf, d = 24, 40, 32
    e = jax.random.normal(k1, (ne, d), dtype=jnp.float32)
    f = jax.random.normal(k2, (nf, d), dtype=jnp.float32)
    sr = jax.random.uniform(k3, (ne, ne), dtype=jnp.float32)
    sp = jax.random.uniform(k4, (nf, nf), dtype=jnp.float32)
    dti = jax.random.uniform(k5, (ne, nf), dtype=jnp.float32)
    cof = jax.random.uniform(k6, (ne, nf), dtype=jnp.float32, minval=0.1, maxval=1.0)

    # tile_m=8 forces a multi-tile grid along the "parallel" row axis even at
    # these small demo shapes; real workloads use the default 256x256 tiles.
    loss = gba_loss(e, sr, f, sp, dti, cof, tile_m=8)
    jax.block_until_ready(loss)

    loss_ref = _gba_loss_ref(e, sr, f, sp, dti, cof)
    assert jnp.allclose(loss, loss_ref, rtol=1e-4, atol=1e-4), (loss, loss_ref)

    print("KERNEL_OK")
</pallas_src>

<mosaic_0001>
module attributes {stable_mosaic.version = 11 : i64} {
  func.func @_cos_sse_kernel(%arg0: i32, %arg1: i32, %arg2: memref<8x128xf32, #tpu.memory_space<vmem>>, %arg3: memref<24x128xf32, #tpu.memory_space<vmem>>, %arg4: memref<8x24xf32, #tpu.memory_space<vmem>>, %arg5: memref<8x1xf32, #tpu.memory_space<vmem>>) attributes {dimension_semantics = [#tpu.dimension_semantics<parallel>, #tpu.dimension_semantics<arbitrary>], iteration_bounds = array<i64: 3, 1>, scalar_prefetch = 0 : i64, scratch_operands = 0 : i64, tpu.core_type = #tpu.core_type<tc>, window_params = [{transform_indices = @transform_0, window_bounds = array<i64: 8, 128>}, {transform_indices = @transform_1, window_bounds = array<i64: 24, 128>}, {transform_indices = @transform_2, window_bounds = array<i64: 8, 24>}, {transform_indices = @transform_3, window_bounds = array<i64: 8, 1>}]} {
    %c0_i32 = arith.constant 0 : i32
    %0 = arith.cmpi eq, %arg1, %c0_i32 : i32
    %1 = arith.extui %0 : i1 to i32
    %c0_i32_0 = arith.constant 0 : i32
    %2 = arith.cmpi ne, %1, %c0_i32_0 : i32
    scf.if %2 {
      %cst_15 = arith.constant 0.000000e+00 : f32
      %30 = vector.broadcast %cst_15 : f32 to vector<8x1xf32>
      %c0_16 = arith.constant 0 : index
      %c0_17 = arith.constant 0 : index
      %31 = vector.load %arg5[%c0_16, %c0_17] : memref<8x1xf32, #tpu.memory_space<vmem>>, vector<8x1xf32>
      tpu.vector_store %arg5[%c0_16, %c0_17], %30 {strides = array<i32>} : memref<8x1xf32, #tpu.memory_space<vmem>>, vector<8x1xf32>,
    } else {
    }
    %c0 = arith.constant 0 : index
    %c0_1 = arith.constant 0 : index
    %3 = vector.load %arg2[%c0, %c0_1] : memref<8x128xf32, #tpu.memory_space<vmem>>, vector<8x128xf32>
    %c0_2 = arith.constant 0 : index
    %c0_3 = arith.constant 0 : index
    %4 = vector.load %arg3[%c0_2, %c0_3] : memref<24x128xf32, #tpu.memory_space<vmem>>, vector<24x128xf32>
    %5 = arith.mulf %3, %3 : vector<8x128xf32>
    %cst = arith.constant dense<0.000000e+00> : vector<8xf32>
    %6 = vector.multi_reduction <add>, %5, %cst [1] : vector<8x128xf32> to vector<8xf32>
    %7 = vector.shape_cast %6 : vector<8xf32> to vector<8x1xf32>
    %cst_4 = arith.constant 1.000000e-30 : f32
    %8 = vector.broadcast %cst_4 : f32 to vector<8x1xf32>
    %9 = arith.maximumf %7, %8 : vector<8x1xf32>
    %10 = math.rsqrt %9 : vector<8x1xf32>
    %11 = arith.mulf %4, %4 : vector<24x128xf32>
    %cst_5 = arith.constant dense<0.000000e+00> : vector<24xf32>
    %12 = vector.multi_reduction <add>, %11, %cst_5 [1] : vector<24x128xf32> to vector<24xf32>
    %13 = vector.shape_cast %12 : vector<24xf32> to vector<24x1xf32>
    %cst_6 = arith.constant 1.000000e-30 : f32
    %14 = vector.broadcast %cst_6 : f32 to vector<24x1xf32>
    %15 = arith.maximumf %13, %14 : vector<24x1xf32>
    %16 = math.rsqrt %15 : vector<24x1xf32>
    %17 = vector.broadcast %10 : vector<8x1xf32> to vector<8x128xf32>
    %18 = arith.mulf %3, %17 : vector<8x128xf32>
    %19 = vector.broadcast %16 : vector<24x1xf32> to vector<24x128xf32>
    %20 = arith.mulf %4, %19 : vector<24x128xf32>
    %cst_7 = arith.constant dense<0.000000e+00> : vector<8x24xf32>
    %21 = tpu.matmul %18, %20, %cst_7 {dimension_numbers = #tpu.dot_dimension_numbers<[1], [1], [0], [0], [0, 0, 1, 0], [], []>} : vector<8x128xf32>, vector<24x128xf32>, vector<8x24xf32> -> vector<8x24xf32>
    %c0_8 = arith.constant 0 : index
    %c0_9 = arith.constant 0 : index
    %22 = vector.load %arg4[%c0_8, %c0_9] : memref<8x24xf32, #tpu.memory_space<vmem>>, vector<8x24xf32>
    %23 = arith.subf %21, %22 : vector<8x24xf32>
    %24 = arith.mulf %23, %23 : vector<8x24xf32>
    %c0_10 = arith.constant 0 : index
    %c0_11 = arith.constant 0 : index
    %25 = vector.load %arg5[%c0_10, %c0_11] : memref<8x1xf32, #tpu.memory_space<vmem>>, vector<8x1xf32>
    %cst_12 = arith.constant dense<0.000000e+00> : vector<8xf32>
    %26 = vector.multi_reduction <add>, %24, %cst_12 [1] : vector<8x24xf32> to vector<8xf32>
    %27 = vector.shape_cast %26 : vector<8xf32> to vector<8x1xf32>
    %28 = arith.addf %25, %27 : vector<8x1xf32>
    %c0_13 = arith.constant 0 : index
    %c0_14 = arith.constant 0 : index
    %29 = vector.load %arg5[%c0_13, %c0_14] : memref<8x1xf32, #tpu.memory_space<vmem>>, vector<8x1xf32>
    tpu.vector_store %arg5[%c0_13, %c0_14], %28 {strides = array<i32>} : memref<8x1xf32, #tpu.memory_space<vmem>>, vector<8x1xf32>,
    return
  }
  func.func @transform_0(%arg0: i32, %arg1: i32) -> (i32, i32) {
    %c0_i32 = arith.constant 0 : i32
    %c0_i32_0 = arith.constant 0 : i32
    return %arg0, %c0_i32 : i32, i32
  }
  func.func @transform_1(%arg0: i32, %arg1: i32) -> (i32, i32) {
    %c0_i32 = arith.constant 0 : i32
    %c0_i32_0 = arith.constant 0 : i32
    return %arg1, %c0_i32 : i32, i32
  }
  func.func @transform_2(%arg0: i32, %arg1: i32) -> (i32, i32) {
    %c0_i32 = arith.constant 0 : i32
    return %arg0, %arg1 : i32, i32
  }
  func.func @transform_3(%arg0: i32, %arg1: i32) -> (i32, i32) {
    %c0_i32 = arith.constant 0 : i32
    %c0_i32_0 = arith.constant 0 : i32
    return %arg0, %c0_i32 : i32, i32
  }
}

</mosaic_0001>

<bundles_post_ra>
// kernel: tpu_custom_call.1
= control target key start
LH: loop header
LB: loop body
LE: loop exit
PB: predicated region body
PF: predicated region fallthrough
CT: control target
= control target key end

     0   :  { %8 = vsyncpa [#allocation3], 0  ;;  %s988_s0 = inlined_call_operand.hbm [shape: f32[24,128], index: 0, kind: input, shape index: {}]   ;;  %s989_s1 = inlined_call_operand.hbm [shape: f32[24,128], index: 1, kind: input, shape index: {}]   ;;  %s990_s2 = inlined_call_operand.hbm [shape: f32[24,24], index: 2, kind: input, shape index: {}]   ;;  %s991_s3 = inlined_call_operand.vmem [shape: f32[24,1], index: 3, kind: output, shape index: {}]  }
   0x1   :  { %10 = vsyncpa [#allocation3 + $0x1], 0 }
   0x2   :  { %11 = vsyncpa [#allocation5], 0  ;;  %s772_s12 = smov 0   ;;  %s774_s13 = smov 0  }
   0x3   :  { %s776_s14 = smov 0   ;;  %s778_s15 = smov 0  }
   0x4   :  { %s780_s16 = smov 0   ;;  %s782_s17 = smov 0  }
   0x5 LB: > { %s29_s18 = sadd.s32 1, %s738_s16  ;;  %s36_s19 = sadd.s32 1, %s730_s14  ;;  %s742_s17 = sphi %s782_s17, %s17_s17   ;;  %s738_s16 = sphi %s780_s16, %s1010_s16   ;;  %s734_s15 = sphi %s778_s15, %s1009_s15   ;;  %s730_s14 = sphi %s776_s14, %s1008_s14   ;;  %s726_s13 = sphi %s774_s13, %s1007_s13   ;;  %s722_s12 = sphi %s772_s12, %s1006_s12  }
   0x6   : > { %p31_p0 = scmp.ge.s32.totalorder %s29_s18, 3  ;;  %p43_p1 = scmp.ne.s32.totalorder %s730_s14, %s726_s13 }
   0x7   : > { %p44_p2 = scmp.eq.s32.totalorder %s742_s17, 0  ;;  %p532_p4 = scmp.lt.s32.totalorder %s742_s17, 3 }
   0x8   : > { %s1012_s18 = smov (%p31_p0, %s29_s18), 0  ;;  %s169_s21 = sand.u32 1, %s742_s17  }
   0x9   : > { %p45_p3 = por %p44_p2, %p43_p1  ;;  %s33_s20 = ssub.s32 %s738_s16, %s1012_s18 }
   0xa   : > { %p34_p5 = scmp.eq.s32.totalorder %s33_s20, 0  ;;  %s171_s22 = sand.u32 1, %s730_s14  }
   0xb   : > { %s486_s23 = sshll.u32 %s738_s16, 7  ;;  %s818_s25 = sshll.u32 %s171_s22, 3 }
   0xc   : > { %s816_s24 = scalar_select %p34_p5, %s730_s14, %s36_s19  }
   0xd   : > { %s825_s28 = scalar_lea.hbm %s988_s0, %s486_s23  ;;  %p827_p6 = pnand %p532_p4, %p45_p3 }
   0xe   : > { %s173_s30 = scalar_lea.vmem [#allocation2], %s818_s25  ;;  %s834_s5 = scalar_lea.sflag [#allocation3], %s169_s21 }
   0xf   : > { %s180_s4 = sshll.u32 %s173_s30, 4  ;;  %s596_s6 = scalar_lea.hbm %s825_s28, 128  ;;  %s832_s4 = int_to_ptr.vmem [resolvable:$true] %s180_s4 }
  0x10   : > { %p597_p7 = scmp.ne.s32.totalorder %s825_s28, %s596_s6  ;;  %p598_p8 = pneg %p827_p6 }
  0x11   : > { %s601_s9 = scalar_lea.hbm %s988_s0, 384  ;;  %p602_p11 = scmp.lt.u32.totalorder %s825_s28, %s988_s0 }
  0x12   : > { %p599_p9 = pnand %p598_p8, %p597_p7  ;;  %p603_p12 = scmp.lt.u32.totalorder %s601_s9, %s596_s6 }
  0x13   : > { %p605_p0 = scmp.lt.u32.totalorder %s596_s6, %s825_s28 }
  0x14   : > { %p600_p10 = pneg %p599_p9  ;;  %p604_p13 = por %p603_p12, %p602_p11 }
  0x16   : > { %p606_p1 = por %p605_p0, %p604_p13 }
  0x18   : > { %p607_p2 = pnand %p606_p1, %p600_p10 }
  0x1a   : > { %610 = shalt.err (!%p607_p2)
}
  0x1b   : > { %s611_s19 = scalar_lea.vmem %s832_s4, 128  ;;  %s744_s20 = smov [#allocation2]  }
  0x1c   : > { %p612_p3 = scmp.ne.s32.totalorder %s832_s4, %s611_s19  ;;  %s616_s21 = sshll.u32 %s744_s20, 4  ;;  %s617_s21 = int_to_ptr.vmem [resolvable:$false] %s616_s21 }
  0x1d   : > { %s618_s22 = scalar_lea.vmem %s617_s21, 256  ;;  %p619_p7 = scmp.lt.s32.totalorder %s832_s4, %s617_s21 }
  0x1e   : > { %p614_p4 = pnand %p612_p3, %p598_p8  ;;  %p620_p9 = scmp.lt.s32.totalorder %s618_s22, %s611_s19 }
  0x20   : > { %p615_p5 = pneg %p614_p4  ;;  %p621_p11 = por %p620_p9, %p619_p7 }
  0x22   : > { %p622_p12 = pnand %p621_p11, %p615_p5 }
  0x24   : > { %625 = shalt.err (!%p622_p12)
}
  0x25   : > { %527 = dma.hbm_to_vmem [thread:$0]  (!%p827_p6), %s825_s28, 128, %s832_s4, %s834_s5  }
  0x26   : > { %s867_s30 = scalar_lea.hbm %s990_s2, %s486_s23  ;;  %s480_s6 = sadd.s32 4294967295, %s742_s17  }
  0x27   : > { %p49_p10 = scmp.ne.s32.totalorder %s726_s13, %s722_s12  ;;  %p874_p13 = scmp.eq.s32.totalorder %s480_s6, 0 }
  0x28   : > { %p482_p0 = scmp.ge.s32.totalorder %s742_s17, 1  ;;  %p140_p1 = scmp.lt.s32.totalorder %s742_s17, 4 }
  0x29   : > { %s998_s7 = scalar_select %p874_p13, 1, 0 }
  0x2a   : > { %p882_p2 = por %p874_p13, %p49_p10  ;;  %p886_p3 = pnand %p482_p0, %p140_p1 }
  0x2b   : > { %s745_s12 = smov [#allocation4]   ;;  %s191_s8 = scalar_lea.vmem [#allocation6], %s818_s25 }
  0x2c   : > { %s999_s28 = scalar_select %p882_p2, 1, 0 }
  0x2d   : > { %s1000_s23 = scalar_select %p886_p3, 1, 0 }
  0x2e   : > { %s155_s4 = sshll.u32 %s745_s12, 4  ;;  %p520_p4 = pneg %p886_p3  ;;  %s892_s4 = int_to_ptr.vmem [resolvable:$true] %s155_s4 }
  0x2f   : > { %s199_s9 = sshll.u32 %s191_s8, 4  ;;  %s626_s11 = scalar_lea.hbm %s867_s30, 128  ;;  %s200_s9 = int_to_ptr.vmem [resolvable:$true] %s199_s9 }
  0x30   : > { %p897_p5 = pnand %p520_p4, %p874_p13  ;;  %p627_p7 = scmp.ne.s32.totalorder %s867_s30, %s626_s11 }
  0x31   : > { %s631_s21 = scalar_lea.hbm %s990_s2, 384  ;;  %p632_p12 = scmp.lt.u32.totalorder %s867_s30, %s990_s2 }
  0x32   : > { %s1001_s10 = scalar_select %p897_p5, 1, 0 }
  0x33   : > { %p629_p9 = pnand %p627_p7, %p598_p8  ;;  %p633_p10 = scmp.lt.u32.totalorder %s631_s21, %s626_s11 }
  0x34   : > { %p635_p1 = scmp.lt.u32.totalorder %s626_s11, %s867_s30 }
  0x35   : > { %p630_p11 = pneg %p629_p9  ;;  %p634_p0 = por %p633_p10, %p632_p12 }
  0x37   : > { %p636_p4 = por %p635_p1, %p634_p0 }
  0x39   : > { %p637_p13 = pnand %p636_p4, %p630_p11 }
  0x3b   : > { %640 = shalt.err (!%p637_p13)
}
  0x3c   : > { %s641_s25 = scalar_lea.vmem %s200_s9, 128  ;;  %s746_s27 = smov [#allocation6]  }
  0x3d   : > { %p642_p2 = scmp.ne.s32.totalorder %s200_s9, %s641_s25  ;;  %s646_s12 = sshll.u32 %s746_s27, 4  ;;  %s647_s12 = int_to_ptr.vmem [resolvable:$false] %s646_s12 }
  0x3e   : > { %s648_s8 = scalar_lea.vmem %s647_s12, 256  ;;  %p649_p3 = scmp.lt.s32.totalorder %s200_s9, %s647_s12 }
  0x3f   : > { %p644_p7 = pnand %p642_p2, %p598_p8  ;;  %p650_p5 = scmp.lt.s32.totalorder %s648_s8, %s641_s25 }
  0x41   : > { %p645_p9 = pneg %p644_p7  ;;  %p651_p10 = por %p650_p5, %p649_p3 }
  0x43   : > { %p652_p12 = pnand %p651_p10, %p645_p9 }
  0x45   : > { %655 = shalt.err (!%p652_p12)
}
  0x46   : > { %530 = dma.hbm_to_vmem [thread:$0]  (!%p827_p6), %s867_s30, 128, %s200_s9, %s834_s5  }
  0x47   : > { %s656_s20 = scalar_lea.hbm %s989_s1, 384  ;;  %p1002_p13 = scmp.ne.s32.totalorder %s1001_s10, 0 }
  0x48   : > { %p657_p8 = scmp.ne.s32.totalorder %s989_s1, %s656_s20  ;;  %p663_p5 = scmp.lt.u32.totalorder %s656_s20, %s989_s1 }
  0x49   : > { %p658_p2 = pneg %p1002_p13 }
  0x4b   : > { %p659_p11 = pnand %p658_p2, %p657_p8 }
  0x4d   : > { %p660_p3 = pneg %p659_p11 }
  0x4f   : > { %p665_p0 = pnand %p663_p5, %p660_p3 }
  0x51   : > { %668 = shalt.err (!%p665_p0)
}
  0x52   : > { %s669_s29 = scalar_lea.vmem %s892_s4, 384  ;;  %p677_p7 = scmp.lt.s32.totalorder %s892_s4, %s892_s4 }
  0x53   : > { %p670_p6 = scmp.ne.s32.totalorder %s892_s4, %s669_s29  ;;  %p678_p9 = scmp.lt.s32.totalorder %s669_s29, %s669_s29 }
  0x55   : > { %p672_p1 = pnand %p670_p6, %p658_p2  ;;  %p679_p10 = por %p678_p9, %p677_p7 }
  0x57   : > { %p673_p4 = pneg %p672_p1 }
  0x59   : > { %p680_p12 = pnand %p679_p10, %p673_p4 }
  0x5b   : > { %683 = shalt.err (!%p680_p12)
}
  0x5c   : > { %s747_s5 = smov 128   ;;  %s748_s30 = smov 8  }
  0x5d   : > { %523 = dma.hbm_to_vmem [thread:$0]  (!%p1002_p13), %s989_s1, 384, %s892_s4, [#allocation5], %s747_s5, %s747_s5, %s748_s30  }
  0x5e   : > { %p1003_p8 = scmp.ne.s32.totalorder %s1000_s23, 0 }
  0x5f   : > { %s210_s12 = sand.u32 (!%p1003_p8), 1, %s480_s6   ;;  %s212_s8 = sand.u32 (!%p1003_p8), 1, %s726_s13  }
  0x60   : > { %208 = sbr.rel (%p1003_p8) target bundleno = 648 (0x288), region = 32  ;;  %s947_s11 = sshll.u32 (!%p1003_p8), %s212_s8, 3 }
  0x61   : > { %s211_s19 = scalar_lea.sflag (!%p1003_p8), [#allocation3], %s210_s12  ;;  %s214_s20 = scalar_lea.vmem (!%p1003_p8), [#allocation2], %s947_s11 }
  0x62   : > { %p1004_p2 = scmp.ne.s32.totalorder (!%p1003_p8), %s999_s28, 0 }
  0x67   : > { %709 = dma.done.wait (%p1004_p2), %s211_s19, 128  }
  0x68   : > { %711 = vsyncadd (%p1004_p2), %s211_s19, 4294967168  ;;  %p1005_p13 = scmp.ne.s32.totalorder %s998_s7, 0 }
  0x6a   : > { %713 = dma.done.wait (%p1005_p13), [#allocation5], 384  }
  0x6b   : > { %715 = vsyncadd (%p1005_p13), [#allocation5], 4294966912  ;;  %s227_s6 = scalar_lea.vmem [#allocation6], %s947_s11 }
  0x6c   : > { %717 = dma.done.wait (%p1004_p2), %s211_s19, 128  }
  0x6d   : > { %719 = vsyncadd (%p1004_p2), %s211_s19, 4294967168  ;;  %v266_v0 = vld [vmem:[#allocation4] sm:$0xff]  ;;  %v267_v1 = vld [vmem:[#allocation4 + $0x8] sm:$0xff]  ;;  %v749_v8 = vmov 0.0|0.0   ;;  %vm750_vm0 = vmmov 0   ;;  %v751_v9 = vmov 0.0  }
  0x6e   : > { %v268_v2 = vld [vmem:[#allocation4 + $0x10] sm:$0xff]  ;;  %v274_v3 = vmul.f32 %v266_v0, %v266_v0  ;;  %v275_v6 = vmul.f32 %v267_v1, %v267_v1  ;;  %509 = vmatprep.subr.bf16.mxu0 %v749_v8  ;;  %506 = vmatprep.mubr.msk.f32.mxu0 %vm750_vm0, %v751_v9  ;;  %p255_p11 = scmp.lt.s32.totalorder %s734_s15, 2  ;;  %vm263_vm1 = vcmask 7168   ;;  %v363_v27 = vld [vmem:[%s227_s6] sm:$0xff]  ;;  %vm367_vm2 = vcmask 195584  }
  0x6f   : > { %v276_v4 = vmul.f32 %v268_v2, %v268_v2  ;;  %v265_v5 = vld [vmem:[%s214_s20] sm:$0xff] }
  0x70   : > { %277 = vadd.xlane.f32.xlu0 %v274_v3  ;;  %v269_v7 = vmul.f32 %v265_v5, %v265_v5  ;;  %s1014_s15 = smov (!%p255_p11, %s734_s15), 2 }
  0x71   : > { %281 = vadd.xlane.f32.xlu1 %v276_v4  ;;  %s493_s7 = sshll.u32 %s1014_s15, 3 }
  0x72   : > { %s258_s4 = scalar_lea.vmem %s991_s3, %s493_s7 }
  0x73   : > { %264 = vst.msk [vmem:[%s258_s4] sm:$0xff] %vm263_vm1, %v751_v9 }
  0x74   : > { %279 = vadd.xlane.f32.xlu0 %v275_v6 }
  0x75   : > { %270 = vadd.xlane.f32.xlu1 %v269_v7 }
  0x7a   : > { %v366_v33 = vld [vmem:[%s258_s4] sm:$0xff] }
  0xfd   : > { %v278_v10 = vpop.xlane.xlu0 %277 }
  0xfe   : > { %v283_v11 = vmax.f32 %v278_v10, 1e-30  ;;  %v282_v12 = vpop.xlane.xlu1 %281 }
  0xff   : > { %v285_v15 = vmax.f32 %v282_v12, 1e-30 }
 0x100   : > { %588 = vrsqrt.f32 %v283_v11 }
 0x101   : > { %v280_v13 = vpop.xlane.xlu0 %279 }
 0x102   : > { %v284_v14 = vmax.f32 %v280_v13, 1e-30  ;;  %v271_v16 = vpop.xlane.xlu1 %270 }
 0x103   : > { %v272_v17 = vmax.f32 %v271_v16, 1e-30 }
 0x104   : > { %590 = vrsqrt.f32 %v284_v14 }
 0x105   : > { %592 = vrsqrt.f32 %v285_v15 }
 0x106   : > { %594 = vrsqrt.f32 %v272_v17 }
 0x10a   : > { %v589_v18 = vpop.eup %588 }
 0x10b   : > { %v290_v20 = vmul.f32 %v589_v18, %v266_v0 }
 0x10e   : > { %v591_v19 = vpop.eup %590 }
 0x10f   : > { %v291_v21 = vmul.f32 %v591_v19, %v267_v1  ;;  %v593_v23 = vpop.eup %592 }
 0x110   : > { %v595_v24 = vpop.eup %594  ;;  %v292_v25 = vmul.f32 %v593_v23, %v268_v2 }
 0x111   : > { %v510_v22 = vpack.c.bf16 %v291_v21, %v290_v20  ;;  %v289_v26 = vmul.f32 %v595_v24, %v265_v5 }
 0x113   : > { %511 = vmatpush3.bf16.xpose.msra.mxu0 %v510_v22 }
 0x114   : > { %504 = vmatprep.subr.mxu0 %v751_v9 }
 0x11b   : > { %505 = vmatpush3.xpose.msra.mxu0 %v292_v25 }
 0x11e   : > { %507 = vmatmul.mubr.f32.vlgmr.msra.gmra.mrb[0].mxu0 %v289_v26 }
 0x1f1   : > { %v359_v28 = vpop.f32.mrb[0].mxu0 }
 0x1f2   : > { %v364_v29 = vsub.f32 %v359_v28, %v363_v27  ;;  %v508_v30 = vpop.f32.mrb[1].mxu0 }
 0x1f4   : > { %v365_v31 = vmul.f32 %v364_v29, %v364_v29 }
 0x1f6   : > { %v368_v32 = vsel %vm367_vm2, %v365_v31, 0.0 }
 0x1f7   : > { %369 = vadd.xlane.f32.xlu0 %v368_v32 }
 0x284   : > { %v370_v34 = vpop.xlane.xlu0 %369 }
 0x285   : > { %v371_v35 = vadd.f32 %v370_v34, %v366_v33 }
 0x287   : > { %373 = vst.msk [vmem:[%s258_s4] sm:$0xff] %vm263_vm1, %v371_v35 }
 0x288 PF: > { %s17_s17 = sadd.s32 1, %s742_s17   ;;  %s1006_s12 = smov %s726_s13 }
 0x289   : > { %p14_p3 = scmp.ge.s32.totalorder %s17_s17, 5   ;;  %s1007_s13 = smov %s730_s14 }
 0x28a   : > { %s1008_s14 = smov %s816_s24  ;;  %s1009_s15 = smov %s738_s16 }
 0x28b   : > { %s1010_s16 = smov %s1012_s18  ;;  %16 = sbr.rel (!%p14_p3) target bundleno = 5 (0x5), region = 92 }
 0x292   :  { %393 = vsyncpa [#allocation3], 1 }
 0x293   :  { %395 = vsyncpa [#allocation3 + $0x1], 1 }
 0x294   :  { %396 = vsyncpa [#allocation5], 1 }

</bundles_post_ra>
